<compile_context>
chip_gen: v7x
topology: tpu7x:2x2x1
jax: 0.10.0
libtpu: 0.0.40
codegen_flags: <defaults>
</compile_context>

<pallas_src>
import math

import jax
import jax.numpy as jnp
from jax.experimental import pallas as pl
from jax.experimental.pallas import tpu as pltpu


# ----------------------------- Pallas kernel ------------------------------ #
def _twin_q_kernel(sa_ref,
                   w1_ref, b1_ref,
                   w2_ref, b2_ref,
                   w3_ref, b3_ref,
                   w4_ref, b4_ref,
                   out_ref):
    """Both Q heads fused in one kernel.

    Layer 1 is head-fused (columns [0:H] = q1, [H:2H] = q2, shared `sa` input);
    layers 2/3/4 are per-head dots on the lane-aligned halves, using stacked
    (2, H, H)/(2, H, 1) weights with no zero padding."""
    cdt = w1_ref.dtype                      # MXU input dtype (bf16)
    H = w2_ref.shape[1]

    sa = sa_ref[...]                        # (bb, S+A), already bf16

    # layer 1: one MXU pass, fused across heads -> (bb, 2H)
    h = jnp.dot(sa, w1_ref[...], preferred_element_type=jnp.float32) + b1_ref[...]
    h = jnp.maximum(h, 0.0).astype(cdt)
    h1 = h[:, :H]                           # lane-aligned (H multiple of 128) views
    h2 = h[:, H:]

    # layers 2/3: per-head (H x H) dots, f32 accumulate, ReLU, recast to bf16
    def hidden_layer(x1, x2, w_ref, b_ref):
        y1 = jnp.dot(x1, w_ref[0], preferred_element_type=jnp.float32) + b_ref[0]
        y2 = jnp.dot(x2, w_ref[1], preferred_element_type=jnp.float32) + b_ref[1]
        return (jnp.maximum(y1, 0.0).astype(cdt),
                jnp.maximum(y2, 0.0).astype(cdt))

    h1, h2 = hidden_layer(h1, h2, w2_ref, b2_ref)
    h1, h2 = hidden_layer(h1, h2, w3_ref, b3_ref)

    # layer 4: per-head (H, 1) dots -> one (bb, 2) output slab
    q1 = jnp.dot(h1, w4_ref[0], preferred_element_type=jnp.float32) + b4_ref[0]
    q2 = jnp.dot(h2, w4_ref[1], preferred_element_type=jnp.float32) + b4_ref[1]
    out_ref[:, 0:1] = q1.astype(out_ref.dtype)
    out_ref[:, 1:2] = q2.astype(out_ref.dtype)


# ------------------------- parameter initialization ------------------------ #
def _orthogonal_linear(key, in_dim, out_dim, std=math.sqrt(2.0), bias_const=0.0):
    """Mirror of torch layer_init: orthogonal_(weight, std), constant_(bias).
    Returns weight as (in_dim, out_dim) for x @ W, bias as (out_dim,)."""
    w_torch_layout = jax.nn.initializers.orthogonal(scale=std)(
        key, (out_dim, in_dim), jnp.float32)
    w = jnp.transpose(w_torch_layout)                     # (in_dim, out_dim)
    b = jnp.full((out_dim,), bias_const, jnp.float32)
    return w, b


def make_critic_params(key, state_dim, action_dim, hidden_dim=256,
                       param_dtype=jnp.bfloat16):
    """Per-head params (reference) and fused/stacked params (kernel), with no
    zero-padded blocks."""
    in_dim = state_dim + action_dim
    dims = [(in_dim, hidden_dim),
            (hidden_dim, hidden_dim),
            (hidden_dim, hidden_dim),
            (hidden_dim, 1)]
    keys = jax.random.split(key, 2 * len(dims))

    heads = []
    for h_idx in range(2):
        layers = []
        for l_idx, (di, do) in enumerate(dims):
            layers.append(_orthogonal_linear(keys[2 * l_idx + h_idx], di, do))
        heads.append(layers)

    (w1a, b1a), (w2a, b2a), (w3a, b3a), (w4a, b4a) = heads[0]
    (w1b, b1b), (w2b, b2b), (w3b, b3b), (w4b, b4b) = heads[1]

    fused = dict(
        w1=jnp.concatenate([w1a, w1b], axis=1).astype(param_dtype),   # (S+A, 2H)
        b1=jnp.concatenate([b1a, b1b])[None, :],                       # (1, 2H) f32
        w2=jnp.stack([w2a, w2b]).astype(param_dtype),                  # (2, H, H)
        b2=jnp.stack([b2a[None, :], b2b[None, :]]),                    # (2, 1, H)
        w3=jnp.stack([w3a, w3b]).astype(param_dtype),                  # (2, H, H)
        b3=jnp.stack([b3a[None, :], b3b[None, :]]),                    # (2, 1, H)
        w4=jnp.stack([w4a, w4b]).astype(param_dtype),                  # (2, H, 1)
        b4=jnp.stack([b4a[None, :], b4b[None, :]]),                    # (2, 1, 1)
    )
    return {"fused": fused, "heads": {"q1": heads[0], "q2": heads[1]}}


# ------------------------------ Critic forward ----------------------------- #
def _choose_block_b(B, block_b):
    """Single block for small B; for large B ensure >=2 grid steps so the
    'parallel' axis can shard across TensorCores (v7x megacore)."""
    if B > block_b:
        return block_b
    if B >= 512:
        half = (B + 1) // 2
        return min(block_b, ((half + 7) // 8) * 8)
    return B


def critic_forward(params, state, action, *, block_b=1024):
    """Equivalent of Critic.forward: returns (q1, q2), each (B, 1) float32."""
    fused = params["fused"]
    cdt = fused["w1"].dtype

    # Pack once in the caller: one bf16 (B, S+A) input -> one layer-1 MXU pass
    # and half the input DMA bytes (per perf review).
    sa = jnp.concatenate([state, action], axis=1).astype(cdt)
    B, SA = sa.shape
    H2 = fused["w1"].shape[1]            # 2 * hidden_dim
    H = H2 // 2

    bb = _choose_block_b(B, block_b)
    grid = (pl.cdiv(B, bb),)

    def rows(i):                          # batch-marching blocks
        return (i, 0)

    weight_order = ("w1", "b1", "w2", "b2", "w3", "b3", "w4", "b4")
    weight_args = [fused[k] for k in weight_order]

    resident = pl.Buffered(1)             # grid-invariant: single VMEM buffer

    def weight_spec(w):
        nd = w.ndim
        return pl.BlockSpec(w.shape, lambda i, _nd=nd: (0,) * _nd,
                            pipeline_mode=resident)

    in_specs = [pl.BlockSpec((bb, SA), rows)] + [weight_spec(w) for w in weight_args]
    out_specs = pl.BlockSpec((bb, 2), rows)

    # advisory cost estimate (unpadded FLOP count) so XLA schedules around us
    param_bytes = sum(int(w.size) * w.dtype.itemsize for w in weight_args)
    flops = 2 * B * (SA * H2 + 2 * H * H + 2 * H * H + 2 * H)
    bytes_accessed = param_bytes + B * SA * sa.dtype.itemsize + B * 2 * 4

    q = pl.pallas_call(
        _twin_q_kernel,
        out_shape=jax.ShapeDtypeStruct((B, 2), jnp.float32),
        grid=grid,
        in_specs=in_specs,
        out_specs=out_specs,
        compiler_params=pltpu.CompilerParams(
            dimension_semantics=("parallel",)),
        cost_estimate=pl.CostEstimate(
            flops=flops, transcendentals=0, bytes_accessed=bytes_accessed),
    )(sa, *weight_args)

    return q[:, 0:1], q[:, 1:2]


# ------------------------------- reference --------------------------------- #
def _critic_ref(params, state, action):
    """Pure-JAX reference using the UNFUSED per-head parameters, with the same
    bf16 weight storage / f32 accumulation the kernel uses."""
    heads = params["heads"]
    cdt = params["fused"]["w2"].dtype
    sa = jnp.concatenate([state, action], axis=1).astype(jnp.float32)

    def head(layers):
        h = sa
        for idx, (w, b) in enumerate(layers):
            h = jnp.dot(h.astype(cdt), w.astype(cdt),
                        preferred_element_type=jnp.float32) + b[None, :]
            if idx < len(layers) - 1:
                h = jnp.maximum(h, 0.0)
        return h

    return head(heads["q1"]), head(heads["q2"])


# ---------------------------------- main ----------------------------------- #
if __name__ == "__main__":
    key = jax.random.PRNGKey(0)
    k_params, k_state, k_action = jax.random.split(key, 3)

    batch = 8
    state_dim = 16
    action_dim = 8
    hidden_dim = 128   # 128-aligned hidden dim (vreg-lane / MXU-tile unit)

    params = make_critic_params(k_params, state_dim, action_dim, hidden_dim)
    state = jax.random.normal(k_state, (batch, state_dim), jnp.float32)
    action = jax.random.normal(k_action, (batch, action_dim), jnp.float32)

    q1, q2 = critic_forward(params, state, action)
    q1 = jax.block_until_ready(q1)
    q2 = jax.block_until_ready(q2)

    # correctness check against the unfused pure-JAX reference
    r1, r2 = _critic_ref(params, state, action)
    assert q1.shape == (batch, 1) and q2.shape == (batch, 1)
    assert jnp.allclose(q1, r1, atol=5e-3, rtol=5e-3)
    assert jnp.allclose(q2, r2, atol=5e-3, rtol=5e-3)

    print("KERNEL_OK")
</pallas_src>

<mosaic_0001>
module attributes {stable_mosaic.version = 11 : i64} {
  func.func @_twin_q_kernel(%arg0: i32, %arg1: memref<8x24xbf16, #tpu.memory_space<vmem>>, %arg2: memref<24x256xbf16, #tpu.memory_space<vmem>>, %arg3: memref<1x256xf32, #tpu.memory_space<vmem>>, %arg4: memref<2x128x128xbf16, #tpu.memory_space<vmem>>, %arg5: memref<2x1x128xf32, #tpu.memory_space<vmem>>, %arg6: memref<2x128x128xbf16, #tpu.memory_space<vmem>>, %arg7: memref<2x1x128xf32, #tpu.memory_space<vmem>>, %arg8: memref<2x128x1xbf16, #tpu.memory_space<vmem>>, %arg9: memref<2x1x1xf32, #tpu.memory_space<vmem>>, %arg10: memref<8x2xf32, #tpu.memory_space<vmem>>) attributes {dimension_semantics = [#tpu.dimension_semantics<parallel>], iteration_bounds = array<i64: 1>, scalar_prefetch = 0 : i64, scratch_operands = 0 : i64, tpu.core_type = #tpu.core_type<tc>, window_params = [{transform_indices = @transform_0, window_bounds = array<i64: 8, 24>}, {pipeline_mode = #tpu.pipeline_mode<synchronous>, transform_indices = @transform_1, window_bounds = array<i64: 24, 256>}, {pipeline_mode = #tpu.pipeline_mode<synchronous>, transform_indices = @transform_2, window_bounds = array<i64: 1, 256>}, {pipeline_mode = #tpu.pipeline_mode<synchronous>, transform_indices = @transform_3, window_bounds = array<i64: 2, 128, 128>}, {pipeline_mode = #tpu.pipeline_mode<synchronous>, transform_indices = @transform_4, window_bounds = array<i64: 2, 1, 128>}, {pipeline_mode = #tpu.pipeline_mode<synchronous>, transform_indices = @transform_5, window_bounds = array<i64: 2, 128, 128>}, {pipeline_mode = #tpu.pipeline_mode<synchronous>, transform_indices = @transform_6, window_bounds = array<i64: 2, 1, 128>}, {pipeline_mode = #tpu.pipeline_mode<synchronous>, transform_indices = @transform_7, window_bounds = array<i64: 2, 128, 1>}, {pipeline_mode = #tpu.pipeline_mode<synchronous>, transform_indices = @transform_8, window_bounds = array<i64: 2, 1, 1>}, {transform_indices = @transform_9, window_bounds = array<i64: 8, 2>}]} {
    %c0 = arith.constant 0 : index
    %c0_0 = arith.constant 0 : index
    %0 = vector.load %arg1[%c0, %c0_0] : memref<8x24xbf16, #tpu.memory_space<vmem>>, vector<8x24xbf16>
    %c0_1 = arith.constant 0 : index
    %c0_2 = arith.constant 0 : index
    %1 = vector.load %arg2[%c0_1, %c0_2] : memref<24x256xbf16, #tpu.memory_space<vmem>>, vector<24x256xbf16>
    %cst = arith.constant dense<0.000000e+00> : vector<8x256xf32>
    %2 = tpu.matmul %0, %1, %cst {dimension_numbers = #tpu.dot_dimension_numbers<[1], [0], [0], [1], [0, 0, 1, 1], [], []>} : vector<8x24xbf16>, vector<24x256xbf16>, vector<8x256xf32> -> vector<8x256xf32>
    %c0_3 = arith.constant 0 : index
    %c0_4 = arith.constant 0 : index
    %3 = vector.load %arg3[%c0_3, %c0_4] : memref<1x256xf32, #tpu.memory_space<vmem>>, vector<1x256xf32>
    %4 = vector.broadcast %3 : vector<1x256xf32> to vector<8x256xf32>
    %5 = arith.addf %2, %4 : vector<8x256xf32>
    %cst_5 = arith.constant 0.000000e+00 : f32
    %6 = vector.broadcast %cst_5 : f32 to vector<8x256xf32>
    %7 = arith.maximumf %5, %6 : vector<8x256xf32>
    %8 = arith.truncf %7 : vector<8x256xf32> to vector<8x256xbf16>
    %9 = vector.extract_strided_slice %8 {offsets = [0, 0], sizes = [8, 128], strides = [1, 1]} : vector<8x256xbf16> to vector<8x128xbf16>
    %10 = vector.extract_strided_slice %8 {offsets = [0, 128], sizes = [8, 128], strides = [1, 1]} : vector<8x256xbf16> to vector<8x128xbf16>
    %c0_6 = arith.constant 0 : index
    %c0_7 = arith.constant 0 : index
    %c0_8 = arith.constant 0 : index
    %11 = vector.load %arg4[%c0_6, %c0_7, %c0_8] : memref<2x128x128xbf16, #tpu.memory_space<vmem>>, vector<1x128x128xbf16>
    %12 = vector.shape_cast %11 : vector<1x128x128xbf16> to vector<128x128xbf16>
    %cst_9 = arith.constant dense<0.000000e+00> : vector<8x128xf32>
    %13 = tpu.matmul %9, %12, %cst_9 {dimension_numbers = #tpu.dot_dimension_numbers<[1], [0], [0], [1], [0, 0, 1, 1], [], []>} : vector<8x128xbf16>, vector<128x128xbf16>, vector<8x128xf32> -> vector<8x128xf32>
    %c0_10 = arith.constant 0 : index
    %c0_11 = arith.constant 0 : index
    %c0_12 = arith.constant 0 : index
    %14 = vector.load %arg5[%c0_10, %c0_11, %c0_12] : memref<2x1x128xf32, #tpu.memory_space<vmem>>, vector<1x1x128xf32>
    %15 = vector.shape_cast %14 : vector<1x1x128xf32> to vector<1x128xf32>
    %16 = vector.broadcast %15 : vector<1x128xf32> to vector<8x128xf32>
    %17 = arith.addf %13, %16 : vector<8x128xf32>
    %c1 = arith.constant 1 : index
    %c0_13 = arith.constant 0 : index
    %c0_14 = arith.constant 0 : index
    %18 = vector.load %arg4[%c1, %c0_13, %c0_14] : memref<2x128x128xbf16, #tpu.memory_space<vmem>>, vector<1x128x128xbf16>
    %19 = vector.shape_cast %18 : vector<1x128x128xbf16> to vector<128x128xbf16>
    %cst_15 = arith.constant dense<0.000000e+00> : vector<8x128xf32>
    %20 = tpu.matmul %10, %19, %cst_15 {dimension_numbers = #tpu.dot_dimension_numbers<[1], [0], [0], [1], [0, 0, 1, 1], [], []>} : vector<8x128xbf16>, vector<128x128xbf16>, vector<8x128xf32> -> vector<8x128xf32>
    %c1_16 = arith.constant 1 : index
    %c0_17 = arith.constant 0 : index
    %c0_18 = arith.constant 0 : index
    %21 = vector.load %arg5[%c1_16, %c0_17, %c0_18] : memref<2x1x128xf32, #tpu.memory_space<vmem>>, vector<1x1x128xf32>
    %22 = vector.shape_cast %21 : vector<1x1x128xf32> to vector<1x128xf32>
    %23 = vector.broadcast %22 : vector<1x128xf32> to vector<8x128xf32>
    %24 = arith.addf %20, %23 : vector<8x128xf32>
    %cst_19 = arith.constant 0.000000e+00 : f32
    %25 = vector.broadcast %cst_19 : f32 to vector<8x128xf32>
    %26 = arith.maximumf %17, %25 : vector<8x128xf32>
    %27 = arith.truncf %26 : vector<8x128xf32> to vector<8x128xbf16>
    %cst_20 = arith.constant 0.000000e+00 : f32
    %28 = vector.broadcast %cst_20 : f32 to vector<8x128xf32>
    %29 = arith.maximumf %24, %28 : vector<8x128xf32>
    %30 = arith.truncf %29 : vector<8x128xf32> to vector<8x128xbf16>
    %c0_21 = arith.constant 0 : index
    %c0_22 = arith.constant 0 : index
    %c0_23 = arith.constant 0 : index
    %31 = vector.load %arg6[%c0_21, %c0_22, %c0_23] : memref<2x128x128xbf16, #tpu.memory_space<vmem>>, vector<1x128x128xbf16>
    %32 = vector.shape_cast %31 : vector<1x128x128xbf16> to vector<128x128xbf16>
    %cst_24 = arith.constant dense<0.000000e+00> : vector<8x128xf32>
    %33 = tpu.matmul %27, %32, %cst_24 {dimension_numbers = #tpu.dot_dimension_numbers<[1], [0], [0], [1], [0, 0, 1, 1], [], []>} : vector<8x128xbf16>, vector<128x128xbf16>, vector<8x128xf32> -> vector<8x128xf32>
    %c0_25 = arith.constant 0 : index
    %c0_26 = arith.constant 0 : index
    %c0_27 = arith.constant 0 : index
    %34 = vector.load %arg7[%c0_25, %c0_26, %c0_27] : memref<2x1x128xf32, #tpu.memory_space<vmem>>, vector<1x1x128xf32>
    %35 = vector.shape_cast %34 : vector<1x1x128xf32> to vector<1x128xf32>
    %36 = vector.broadcast %35 : vector<1x128xf32> to vector<8x128xf32>
    %37 = arith.addf %33, %36 : vector<8x128xf32>
    %c1_28 = arith.constant 1 : index
    %c0_29 = arith.constant 0 : index
    %c0_30 = arith.constant 0 : index
    %38 = vector.load %arg6[%c1_28, %c0_29, %c0_30] : memref<2x128x128xbf16, #tpu.memory_space<vmem>>, vector<1x128x128xbf16>
    %39 = vector.shape_cast %38 : vector<1x128x128xbf16> to vector<128x128xbf16>
    %cst_31 = arith.constant dense<0.000000e+00> : vector<8x128xf32>
    %40 = tpu.matmul %30, %39, %cst_31 {dimension_numbers = #tpu.dot_dimension_numbers<[1], [0], [0], [1], [0, 0, 1, 1], [], []>} : vector<8x128xbf16>, vector<128x128xbf16>, vector<8x128xf32> -> vector<8x128xf32>
    %c1_32 = arith.constant 1 : index
    %c0_33 = arith.constant 0 : index
    %c0_34 = arith.constant 0 : index
    %41 = vector.load %arg7[%c1_32, %c0_33, %c0_34] : memref<2x1x128xf32, #tpu.memory_space<vmem>>, vector<1x1x128xf32>
    %42 = vector.shape_cast %41 : vector<1x1x128xf32> to vector<1x128xf32>
    %43 = vector.broadcast %42 : vector<1x128xf32> to vector<8x128xf32>
    %44 = arith.addf %40, %43 : vector<8x128xf32>
    %cst_35 = arith.constant 0.000000e+00 : f32
    %45 = vector.broadcast %cst_35 : f32 to vector<8x128xf32>
    %46 = arith.maximumf %37, %45 : vector<8x128xf32>
    %47 = arith.truncf %46 : vector<8x128xf32> to vector<8x128xbf16>
    %cst_36 = arith.constant 0.000000e+00 : f32
    %48 = vector.broadcast %cst_36 : f32 to vector<8x128xf32>
    %49 = arith.maximumf %44, %48 : vector<8x128xf32>
    %50 = arith.truncf %49 : vector<8x128xf32> to vector<8x128xbf16>
    %c0_37 = arith.constant 0 : index
    %c0_38 = arith.constant 0 : index
    %c0_39 = arith.constant 0 : index
    %51 = vector.load %arg8[%c0_37, %c0_38, %c0_39] : memref<2x128x1xbf16, #tpu.memory_space<vmem>>, vector<1x128x1xbf16>
    %52 = vector.shape_cast %51 : vector<1x128x1xbf16> to vector<128x1xbf16>
    %cst_40 = arith.constant dense<0.000000e+00> : vector<8x1xf32>
    %53 = tpu.matmul %47, %52, %cst_40 {dimension_numbers = #tpu.dot_dimension_numbers<[1], [0], [0], [1], [0, 0, 1, 1], [], []>} : vector<8x128xbf16>, vector<128x1xbf16>, vector<8x1xf32> -> vector<8x1xf32>
    %c0_41 = arith.constant 0 : index
    %c0_42 = arith.constant 0 : index
    %c0_43 = arith.constant 0 : index
    %54 = vector.load %arg9[%c0_41, %c0_42, %c0_43] : memref<2x1x1xf32, #tpu.memory_space<vmem>>, vector<1x1x1xf32>
    %55 = vector.shape_cast %54 : vector<1x1x1xf32> to vector<1x1xf32>
    %56 = vector.broadcast %55 : vector<1x1xf32> to vector<8x1xf32>
    %57 = arith.addf %53, %56 : vector<8x1xf32>
    %c1_44 = arith.constant 1 : index
    %c0_45 = arith.constant 0 : index
    %c0_46 = arith.constant 0 : index
    %58 = vector.load %arg8[%c1_44, %c0_45, %c0_46] : memref<2x128x1xbf16, #tpu.memory_space<vmem>>, vector<1x128x1xbf16>
    %59 = vector.shape_cast %58 : vector<1x128x1xbf16> to vector<128x1xbf16>
    %cst_47 = arith.constant dense<0.000000e+00> : vector<8x1xf32>
    %60 = tpu.matmul %50, %59, %cst_47 {dimension_numbers = #tpu.dot_dimension_numbers<[1], [0], [0], [1], [0, 0, 1, 1], [], []>} : vector<8x128xbf16>, vector<128x1xbf16>, vector<8x1xf32> -> vector<8x1xf32>
    %c1_48 = arith.constant 1 : index
    %c0_49 = arith.constant 0 : index
    %c0_50 = arith.constant 0 : index
    %61 = vector.load %arg9[%c1_48, %c0_49, %c0_50] : memref<2x1x1xf32, #tpu.memory_space<vmem>>, vector<1x1x1xf32>
    %62 = vector.shape_cast %61 : vector<1x1x1xf32> to vector<1x1xf32>
    %63 = vector.broadcast %62 : vector<1x1xf32> to vector<8x1xf32>
    %64 = arith.addf %60, %63 : vector<8x1xf32>
    %c0_51 = arith.constant 0 : index
    %c0_52 = arith.constant 0 : index
    %65 = vector.load %arg10[%c0_51, %c0_52] : memref<8x2xf32, #tpu.memory_space<vmem>>, vector<8x1xf32>
    tpu.vector_store %arg10[%c0_51, %c0_52], %57 {strides = array<i32>} : memref<8x2xf32, #tpu.memory_space<vmem>>, vector<8x1xf32>,
    %c0_53 = arith.constant 0 : index
    %c1_54 = arith.constant 1 : index
    %66 = vector.load %arg10[%c0_53, %c1_54] : memref<8x2xf32, #tpu.memory_space<vmem>>, vector<8x1xf32>
    tpu.vector_store %arg10[%c0_53, %c1_54], %64 {strides = array<i32>} : memref<8x2xf32, #tpu.memory_space<vmem>>, vector<8x1xf32>,
    return
  }
  func.func @transform_0(%arg0: i32) -> (i32, i32) {
    %c0_i32 = arith.constant 0 : i32
    %c0_i32_0 = arith.constant 0 : i32
    return %arg0, %c0_i32 : i32, i32
  }
  func.func @transform_1(%arg0: i32) -> (i32, i32) {
    %c0_i32 = arith.constant 0 : i32
    %c0_i32_0 = arith.constant 0 : i32
    %c0_i32_1 = arith.constant 0 : i32
    return %c0_i32, %c0_i32_0 : i32, i32
  }
  func.func @transform_2(%arg0: i32) -> (i32, i32) {
    %c0_i32 = arith.constant 0 : i32
    %c0_i32_0 = arith.constant 0 : i32
    %c0_i32_1 = arith.constant 0 : i32
    return %c0_i32, %c0_i32_0 : i32, i32
  }
  func.func @transform_3(%arg0: i32) -> (i32, i32, i32) {
    %c0_i32 = arith.constant 0 : i32
    %c0_i32_0 = arith.constant 0 : i32
    %c0_i32_1 = arith.constant 0 : i32
    %c0_i32_2 = arith.constant 0 : i32
    return %c0_i32, %c0_i32_0, %c0_i32_1 : i32, i32, i32
  }
  func.func @transform_4(%arg0: i32) -> (i32, i32, i32) {
    %c0_i32 = arith.constant 0 : i32
    %c0_i32_0 = arith.constant 0 : i32
    %c0_i32_1 = arith.constant 0 : i32
    %c0_i32_2 = arith.constant 0 : i32
    return %c0_i32, %c0_i32_0, %c0_i32_1 : i32, i32, i32
  }
  func.func @transform_5(%arg0: i32) -> (i32, i32, i32) {
    %c0_i32 = arith.constant 0 : i32
    %c0_i32_0 = arith.constant 0 : i32
    %c0_i32_1 = arith.constant 0 : i32
    %c0_i32_2 = arith.constant 0 : i32
    return %c0_i32, %c0_i32_0, %c0_i32_1 : i32, i32, i32
  }
  func.func @transform_6(%arg0: i32) -> (i32, i32, i32) {
    %c0_i32 = arith.constant 0 : i32
    %c0_i32_0 = arith.constant 0 : i32
    %c0_i32_1 = arith.constant 0 : i32
    %c0_i32_2 = arith.constant 0 : i32
    return %c0_i32, %c0_i32_0, %c0_i32_1 : i32, i32, i32
  }
  func.func @transform_7(%arg0: i32) -> (i32, i32, i32) {
    %c0_i32 = arith.constant 0 : i32
    %c0_i32_0 = arith.constant 0 : i32
    %c0_i32_1 = arith.constant 0 : i32
    %c0_i32_2 = arith.constant 0 : i32
    return %c0_i32, %c0_i32_0, %c0_i32_1 : i32, i32, i32
  }
  func.func @transform_8(%arg0: i32) -> (i32, i32, i32) {
    %c0_i32 = arith.constant 0 : i32
    %c0_i32_0 = arith.constant 0 : i32
    %c0_i32_1 = arith.constant 0 : i32
    %c0_i32_2 = arith.constant 0 : i32
    return %c0_i32, %c0_i32_0, %c0_i32_1 : i32, i32, i32
  }
  func.func @transform_9(%arg0: i32) -> (i32, i32) {
    %c0_i32 = arith.constant 0 : i32
    %c0_i32_0 = arith.constant 0 : i32
    return %arg0, %c0_i32 : i32, i32
  }
}

</mosaic_0001>

<bundles_post_ra>
// kernel: tpu_custom_call.1
= control target key start
LH: loop header
LB: loop body
LE: loop exit
PB: predicated region body
PF: predicated region fallthrough
CT: control target
= control target key end

     0   :  { %14 = vsyncpa [#allocation3], 0  ;;  %s1492_s0 = inlined_call_operand.vmem [shape: bf16[8,24], index: 0, kind: input, shape index: {}]   ;;  %s1493_s1 = inlined_call_operand.hbm [shape: bf16[24,256], index: 1, kind: input, shape index: {}]   ;;  %s1494_s2 = inlined_call_operand.vmem [shape: f32[1,256], index: 2, kind: input, shape index: {}]   ;;  %s1495_s3 = inlined_call_operand.vmem [shape: bf16[2,128,128], index: 3, kind: input, shape index: {}]   ;;  %s1496_s4 = inlined_call_operand.vmem [shape: f32[2,1,128], index: 4, kind: input, shape index: {}]   ;;  %s1497_s5 = inlined_call_operand.hbm [shape: bf16[2,128,128], index: 5, kind: input, shape index: {}]   ;;  %s1498_s6 = inlined_call_operand.vmem [shape: f32[2,1,128], index: 6, kind: input, shape index: {}]   ;;  %s1499_s7 = inlined_call_operand.vmem [shape: bf16[2,128,1], index: 7, kind: input, shape index: {}]   ;;  %s1500_s8 = inlined_call_operand.vmem [shape: f32[2,1,1], index: 8, kind: input, shape index: {}]   ;;  %s1501_s9 = inlined_call_operand.vmem [shape: f32[8,2], index: 9, kind: output, shape index: {}]  }
   0x1   :  { %15 = vsyncpa [#allocation5], 0  ;;  %s1222_s30 = smov [#allocation2]   ;;  %s1174_s13 = scalar_lea.hbm %s1493_s1, 384 }
   0x2   :  { %s23_s10 = sshll.u32 %s1222_s30, 4  ;;  %p1175_p0 = scmp.ne.s32.totalorder %s1493_s1, %s1174_s13  ;;  %s24_s10 = int_to_ptr.vmem [resolvable:$true] %s23_s10 }
   0x3   :  { %p1178_p1 = scmp.lt.u32.totalorder %s1174_s13, %s1493_s1 }
   0x5   :  { %p1180_p2 = pnand %p1178_p1, %p1175_p0 }
   0x7   :  { %1183 = shalt.err (!%p1180_p2)
}
   0x8   :  { %s1184_s18 = scalar_lea.vmem %s24_s10, 384  ;;  %p1189_p4 = scmp.lt.s32.totalorder %s24_s10, %s24_s10 }
   0x9   :  { %p1185_p3 = scmp.ne.s32.totalorder %s24_s10, %s1184_s18  ;;  %p1190_p5 = scmp.lt.s32.totalorder %s1184_s18, %s1184_s18 }
   0xb   :  { %p1191_p6 = por %p1190_p5, %p1189_p4 }
   0xd   :  { %p1192_p7 = pnand %p1191_p6, %p1185_p3 }
   0xf   :  { %1195 = shalt.err (!%p1192_p7)
}
  0x10   :  { %s1223_s19 = smov 128   ;;  %s1224_s20 = smov 8  }
  0x11   :  { %29 = dma.hbm_to_vmem [thread:$0]  %s1493_s1, 384, %s24_s10, [#allocation3], %s1223_s19, %s1223_s19, %s1224_s20  }
  0x12   :  { %s1225_s23 = smov [#allocation4]   ;;  %s1196_s27 = scalar_lea.hbm %s1497_s5, 2048 }
  0x13   :  { %s41_s24 = sshll.u32 %s1225_s23, 4  ;;  %p1197_p8 = scmp.ne.s32.totalorder %s1497_s5, %s1196_s27  ;;  %s42_s24 = int_to_ptr.vmem [resolvable:$true] %s41_s24 }
  0x14   :  { %p1200_p9 = scmp.lt.u32.totalorder %s1196_s27, %s1497_s5 }
  0x16   :  { %p1202_p10 = pnand %p1200_p9, %p1197_p8 }
  0x18   :  { %1205 = shalt.err (!%p1202_p10)
}
  0x19   :  { %s1206_s12 = scalar_lea.vmem %s42_s24, 2048  ;;  %p1211_p12 = scmp.lt.s32.totalorder %s42_s24, %s42_s24 }
  0x1a   :  { %p1207_p11 = scmp.ne.s32.totalorder %s42_s24, %s1206_s12  ;;  %p1212_p13 = scmp.lt.s32.totalorder %s1206_s12, %s1206_s12 }
  0x1c   :  { %p1213_p0 = por %p1212_p13, %p1211_p12 }
  0x1e   :  { %p1214_p1 = pnand %p1213_p0, %p1207_p11 }
  0x20   :  { %1217 = shalt.err (!%p1214_p1)
}
  0x21   :  { %s1226_s1 = smov 64   ;;  %s1227_s10 = smov 4  }
  0x22   :  { %47 = dma.hbm_to_vmem [thread:$0]  %s1497_s5, 2048, %s42_s24, [#allocation5], %s1226_s1, %s1226_s1, %s1227_s10  }
  0x23   :  { %1218 = dma.done.wait [#allocation3], 384  }
  0x24   :  { %1219 = vsyncadd [#allocation3], 4294966912 }
  0x25   :  { %1220 = dma.done.wait [#allocation5], 2048  }
  0x26   :  { %1221 = vsyncadd [#allocation5], 4294965248  ;;  %v1228_v0 = vmov 0   ;;  %v1229_v1 = vmov 0.0   ;;  %v1121_v2 = vld [vmem:[#allocation2 + $0x4] ss:$8 sps:$4 sm:$0xff]   ;;  %v67_v25 = vlaneseq }
  0x27   :  { %135 = vmatprep.mubr.bf16.mxu0 %v1228_v0  ;;  %991 = vmatprep.subr.bf16.mxu1 %v1229_v1  ;;  %v1123_v3 = vld [vmem:[#allocation2] ss:$8 sps:$4 sm:$0xff]   ;;  %v64_v4 = vld [vmem:[#allocation2 + $0x10] sm:$0xff]  ;;  %vm96_vm0 = vcmask 1043456   ;;  %vm92_vm1 = vcmask 195584   ;;  %v1132_v14 = vld [vmem:[%s1495_s3 + $0x18] sm:$0xff]  }
  0x28   :  { %103 = vmatprep.subr.bf16.mxu0 %v1121_v2  ;;  %v845_v5 = vcombine.high %v64_v4, %v64_v4  ;;  %v844_v6 = vcombine.low %v64_v4, %v64_v4  ;;  %v1126_v7 = vld [vmem:[%s1495_s3] sm:$0xff]   ;;  %v1128_v9 = vld [vmem:[%s1495_s3 + $0x8] sm:$0xff]   ;;  %v1130_v12 = vld [vmem:[%s1495_s3 + $0x10] sm:$0xff]   ;;  %vm1230_vm2 = vmmov 0   ;;  %v68_v26 = vshrl.u32 %v67_v25, 7  ;;  %s1231_s5 = smov 1  }
  0x29   :  { %104 = vmatpush1.bf16.msra.mxu0 %v1123_v3  ;;  %992 = vmatpush3.bf16.msra.mxu1 %v1126_v7  ;;  %v61_v10 = vld [vmem:[%s1492_s0] sm:$0xf]  ;;  %v1129_v13 = vld [vmem:[%s1495_s3 + $0x48] sm:$0xff]   ;;  %v1131_v15 = vld [vmem:[%s1495_s3 + $0x50] sm:$0xff]   ;;  %vm828_vm3 = vcmask 7168   ;;  %vm834_vm4 = vcmask 15368  }
  0x2a   :  { %846 = vmatprep.subr.msk.bf16.mxu0 %vm96_vm0, %v845_v5  ;;  %v98_v8 = vsel %vm96_vm0, %v844_v6, 0  ;;  %993 = vmatprep.subr.bf16.mxu1 %v1229_v1  ;;  %v1127_v11 = vld [vmem:[%s1495_s3 + $0x40] sm:$0xff]   ;;  %v1133_v17 = vld [vmem:[%s1495_s3 + $0x58] sm:$0xff]   ;;  %v1136_v18 = vld [vmem:[%s1495_s3 + $0x28] sm:$0xff]   ;;  %v69_v27 = vsub.s32 0, %v68_v26  ;;  %v73_v29 = vsub.s32 1, %v68_v26 }
  0x2b   :  { %v1134_v16 = vld [vmem:[%s1495_s3 + $0x20] sm:$0xff]   ;;  %v1137_v20 = vld [vmem:[%s1495_s3 + $0x68] sm:$0xff]   ;;  %v1138_v21 = vld [vmem:[%s1495_s3 + $0x30] sm:$0xff]   ;;  %1007 = vmatprep.mubr.msk.bf16.mxu1 %vm1230_vm2, %v1229_v1 }
  0x2c   :  { %v1135_v19 = vld [vmem:[%s1495_s3 + $0x60] sm:$0xff]   ;;  %v1139_v22 = vld [vmem:[%s1495_s3 + $0x70] sm:$0xff]   ;;  %v1140_v23 = vld [vmem:[%s1495_s3 + $0x38] sm:$0xff]  }
  0x2d   :  { %106 = vmatpush1.bf16.msra.mxu0 %v98_v8  ;;  %994 = vmatpush3.bf16.msra.mxu1 %v1128_v9  ;;  %v1141_v24 = vld [vmem:[%s1495_s3 + $0x78] sm:$0xff]   ;;  %v65_v28 = vld [vmem:[%s1494_s2] sm:$0x3]  ;;  %v1146_v46 = vld [vmem:[#allocation4 + $0x10] sm:$0xff]  }
  0x2e   :  { %1011 = vmatprep.subr.bf16.mxu0 %v1229_v1  ;;  %995 = vmatprep.subr.bf16.mxu1 %v1229_v1  ;;  %v70_v30 = vrot.slane %v65_v28, %v69_v27  ;;  %v74_v31 = vrot.slane %v65_v28, %v73_v29  ;;  %v1142_v40 = vld [vmem:[#allocation4] sm:$0xff]   ;;  %v1144_v44 = vld [vmem:[#allocation4 + $0x8] sm:$0xff]   ;;  %v1147_v47 = vld [vmem:[#allocation4 + $0x50] sm:$0xff]  }
  0x2f   :  { %v1143_v42 = vld [vmem:[#allocation4 + $0x40] sm:$0xff]   ;;  %v1145_v45 = vld [vmem:[#allocation4 + $0x48] sm:$0xff]   ;;  %v1148_v48 = vld [vmem:[#allocation4 + $0x18] sm:$0xff]  }
  0x30   :  { %847 = vmatmul.mubr.msk.bf16.vlgmr.msra.gmra.mrb[0].mxu0 %vm92_vm1, %v61_v10  ;;  %v1149_v49 = vld [vmem:[#allocation4 + $0x58] sm:$0xff]   ;;  %v1150_v50 = vld [vmem:[#allocation4 + $0x20] sm:$0xff]   ;;  %v1152_v52 = vld [vmem:[#allocation4 + $0x28] sm:$0xff]  }
  0x31   :  { %1012 = vmatpush3.bf16.msra.mxu0 %v1127_v11  ;;  %996 = vmatpush3.bf16.msra.mxu1 %v1130_v12  ;;  %v1151_v51 = vld [vmem:[#allocation4 + $0x60] sm:$0xff]   ;;  %v1153_v53 = vld [vmem:[#allocation4 + $0x68] sm:$0xff]   ;;  %v1154_v54 = vld [vmem:[#allocation4 + $0x30] sm:$0xff]  }
  0x32   :  { %1013 = vmatprep.subr.bf16.mxu0 %v1229_v1  ;;  %997 = vmatprep.subr.bf16.mxu1 %v1229_v1  ;;  %v1155_v55 = vld [vmem:[#allocation4 + $0x70] sm:$0xff]   ;;  %v1156_v56 = vld [vmem:[#allocation4 + $0x38] sm:$0xff]   ;;  %v848_v58 = vld [vmem:[%s1496_s4] ss:$0 sm:$0xff] }
  0x33   :  { %1027 = vmatprep.mubr.msk.bf16.mxu0 %vm1230_vm2, %v1229_v1  ;;  %v1157_v57 = vld [vmem:[#allocation4 + $0x78] sm:$0xff]   ;;  %v874_v59 = vld [vmem:[%s1496_s4 + $0x1] ss:$0 sm:$0xff]  ;;  %v1172_v25 = vld [vmem:[%s1499_s7 + $0x38] sm:$0xff]  }
  0x34   :  { %v1158_v9 = vld [vmem:[%s1499_s7] sm:$0xff]   ;;  %v1173_v26 = vld [vmem:[%s1499_s7 + $0x78] sm:$0xff]  }
  0x35   :  { %1014 = vmatpush3.bf16.msra.mxu0 %v1129_v13  ;;  %998 = vmatpush3.bf16.msra.mxu1 %v1132_v14  ;;  %v1159_v11 = vld [vmem:[%s1499_s7 + $0x40] sm:$0xff]   ;;  %v1160_v13 = vld [vmem:[%s1499_s7 + $0x8] sm:$0xff]  }
  0x36   :  { %1015 = vmatprep.subr.bf16.mxu0 %v1229_v1  ;;  %999 = vmatprep.subr.bf16.mxu1 %v1229_v1  ;;  %v1161_v14 = vld [vmem:[%s1499_s7 + $0x48] sm:$0xff]   ;;  %v883_v27 = vld [vmem:[%s1498_s6] ss:$0 sm:$0xff]  ;;  %v893_v28 = vld [vmem:[%s1498_s6 + $0x1] ss:$0 sm:$0xff] }
  0x39   :  { %1016 = vmatpush3.bf16.msra.mxu0 %v1131_v15  ;;  %1000 = vmatpush3.bf16.msra.mxu1 %v1134_v16  ;;  %v1162_v15 = vld [vmem:[%s1499_s7 + $0x10] sm:$0xff]  }
  0x3a   :  { %1017 = vmatprep.subr.bf16.mxu0 %v1229_v1  ;;  %1001 = vmatprep.subr.bf16.mxu1 %v1229_v1  ;;  %v1163_v16 = vld [vmem:[%s1499_s7 + $0x50] sm:$0xff]  }
  0x3d   :  { %1018 = vmatpush3.bf16.msra.mxu0 %v1133_v17  ;;  %1002 = vmatpush3.bf16.msra.mxu1 %v1136_v18  ;;  %v1164_v17 = vld [vmem:[%s1499_s7 + $0x18] sm:$0xff]  }
  0x3e   :  { %1019 = vmatprep.subr.bf16.mxu0 %v1229_v1  ;;  %1003 = vmatprep.subr.bf16.mxu1 %v1229_v1  ;;  %v1165_v18 = vld [vmem:[%s1499_s7 + $0x58] sm:$0xff]  }
  0x41   :  { %1020 = vmatpush3.bf16.msra.mxu0 %v1135_v19  ;;  %1004 = vmatpush3.bf16.msra.mxu1 %v1138_v21  ;;  %v1166_v19 = vld [vmem:[%s1499_s7 + $0x20] sm:$0xff]   ;;  %v1168_v21 = vld [vmem:[%s1499_s7 + $0x28] sm:$0xff]  }
  0x42   :  { %1021 = vmatprep.subr.bf16.mxu0 %v1229_v1  ;;  %1005 = vmatprep.subr.bf16.mxu1 %v1229_v1 }
  0x45   :  { %1022 = vmatpush3.bf16.msra.mxu0 %v1137_v20  ;;  %1006 = vmatpush3.bf16.msra.mxu1 %v1140_v23  ;;  %v1167_v20 = vld [vmem:[%s1499_s7 + $0x60] sm:$0xff]   ;;  %v1170_v23 = vld [vmem:[%s1499_s7 + $0x30] sm:$0xff]  }
  0x46   :  { %1023 = vmatprep.subr.bf16.mxu0 %v1229_v1  ;;  %1031 = vmatprep.subr.bf16.mxu1 %v1229_v1 }
  0x49   :  { %1024 = vmatpush3.bf16.msra.mxu0 %v1139_v22  ;;  %v1169_v22 = vld [vmem:[%s1499_s7 + $0x68] sm:$0xff]  }
  0x4a   :  { %1025 = vmatprep.subr.bf16.mxu0 %v1229_v1 }
  0x4d   :  { %1026 = vmatpush3.bf16.msra.mxu0 %v1141_v24  ;;  %v1171_v24 = vld [vmem:[%s1499_s7 + $0x70] sm:$0xff]  }
  0x4e   :  { %1051 = vmatprep.subr.bf16.mxu0 %v1229_v1 }
 0x103   :  { %v137_v32 = vpop.f32.mrb[0].mxu0 }
 0x104   :  { %v138_v33 = vadd.f32 %v137_v32, %v70_v30  ;;  %v139_v34 = vpop.f32.mrb[1].mxu0 }
 0x105   :  { %v140_v35 = vadd.f32 %v139_v34, %v74_v31  ;;  %v141_v36 = vpop.f32.mrb[2].mxu0 }
 0x106   :  { %v144_v37 = vmax.f32 %v138_v33, 0.0  ;;  %v142_v38 = vpop.f32.mrb[3].mxu0 }
 0x107   :  { %v145_v39 = vmax.f32 %v140_v35, 0.0 }
 0x108   :  { %v146_v41 = vpack.c.bf16 %v144_v37, %v144_v37 }
 0x109   :  { %v147_v43 = vpack.c.bf16 %v145_v39, %v145_v39 }
 0x10a   :  { %1008 = vmatmul.mubr.bf16.vlgmr.msra.gmra.mrb[0].mxu1 %v146_v41 }
 0x10b   :  { %1028 = vmatmul.mubr.bf16.vlgmr.msra.gmra.mrb[4].mxu0 %v147_v43  ;;  %1032 = vmatpush3.bf16.msra.mxu1 %v1142_v40  ;;  %v928_v43 = vld [vmem:[%s1500_s8 + $0x1] ss:$0 sm:$0xff] }
 0x10c   :  { %1052 = vmatpush3.bf16.msra.mxu0 %v1143_v42  ;;  %1033 = vmatprep.subr.bf16.mxu1 %v1229_v1  ;;  %v902_v42 = vld [vmem:[%s1500_s8] ss:$0 sm:$0xff] }
 0x10d   :  { %1053 = vmatprep.subr.bf16.mxu0 %v1229_v1  ;;  %1047 = vmatprep.mubr.msk.bf16.mxu1 %vm1230_vm2, %v1229_v1 }
 0x10e   :  { %1067 = vmatprep.mubr.msk.bf16.mxu0 %vm1230_vm2, %v1229_v1 }
 0x10f   :  { %1034 = vmatpush3.bf16.msra.mxu1 %v1144_v44 }
 0x110   :  { %1054 = vmatpush3.bf16.msra.mxu0 %v1145_v45  ;;  %1035 = vmatprep.subr.bf16.mxu1 %v1229_v1 }
 0x111   :  { %1055 = vmatprep.subr.bf16.mxu0 %v1229_v1 }
 0x113   :  { %1036 = vmatpush3.bf16.msra.mxu1 %v1146_v46 }
 0x114   :  { %1056 = vmatpush3.bf16.msra.mxu0 %v1147_v47  ;;  %1037 = vmatprep.subr.bf16.mxu1 %v1229_v1 }
 0x115   :  { %1057 = vmatprep.subr.bf16.mxu0 %v1229_v1 }
 0x117   :  { %1038 = vmatpush3.bf16.msra.mxu1 %v1148_v48 }
 0x118   :  { %1058 = vmatpush3.bf16.msra.mxu0 %v1149_v49  ;;  %1039 = vmatprep.subr.bf16.mxu1 %v1229_v1 }
 0x119   :  { %1059 = vmatprep.subr.bf16.mxu0 %v1229_v1 }
 0x11b   :  { %1040 = vmatpush3.bf16.msra.mxu1 %v1150_v50 }
 0x11c   :  { %1060 = vmatpush3.bf16.msra.mxu0 %v1151_v51  ;;  %1041 = vmatprep.subr.bf16.mxu1 %v1229_v1 }
 0x11d   :  { %1061 = vmatprep.subr.bf16.mxu0 %v1229_v1 }
 0x11f   :  { %1042 = vmatpush3.bf16.msra.mxu1 %v1152_v52 }
 0x120   :  { %1062 = vmatpush3.bf16.msra.mxu0 %v1153_v53  ;;  %1043 = vmatprep.subr.bf16.mxu1 %v1229_v1 }
 0x121   :  { %1063 = vmatprep.subr.bf16.mxu0 %v1229_v1 }
 0x123   :  { %1044 = vmatpush3.bf16.msra.mxu1 %v1154_v54 }
 0x124   :  { %1064 = vmatpush3.bf16.msra.mxu0 %v1155_v55  ;;  %1045 = vmatprep.subr.bf16.mxu1 %v1229_v1 }
 0x125   :  { %1065 = vmatprep.subr.bf16.mxu0 %v1229_v1 }
 0x127   :  { %1046 = vmatpush3.bf16.msra.mxu1 %v1156_v56 }
 0x128   :  { %1066 = vmatpush3.bf16.msra.mxu0 %v1157_v57  ;;  %1071 = vmatprep.subr.bf16.mxu1 %v1229_v1 }
 0x129   :  { %1091 = vmatprep.subr.bf16.mxu0 %v1229_v1 }
 0x1dd   :  { %v253_v60 = vpop.f32.mrb[0].mxu1 }
 0x1de   :  { %v254_v61 = vadd.f32 %v848_v58, %v253_v60  ;;  %v1009_v62 = vpop.f32.mrb[1].mxu1  ;;  %v366_v63 = vpop.f32.mrb[4].mxu0 }
 0x1df   :  { %v367_v0 = vadd.f32 %v874_v59, %v366_v63  ;;  %v256_v2 = vpop.f32.mrb[2].mxu1  ;;  %v1029_v3 = vpop.f32.mrb[5].mxu0 }
 0x1e0   :  { %v372_v4 = vmax.f32 %v254_v61, 0.0  ;;  %v1010_v5 = vpop.f32.mrb[3].mxu1  ;;  %v369_v6 = vpop.f32.mrb[6].mxu0 }
 0x1e1   :  { %v374_v7 = vmax.f32 %v367_v0, 0.0  ;;  %v1030_v8 = vpop.f32.mrb[7].mxu0 }
 0x1e2   :  { %v373_v10 = vpack.c.bf16 %v372_v4, %v372_v4 }
 0x1e3   :  { %v375_v12 = vpack.c.bf16 %v374_v7, %v374_v7 }
 0x1e4   :  { %1048 = vmatmul.mubr.bf16.vlgmr.msra.gmra.mrb[4].mxu1 %v373_v10 }
 0x1e5   :  { %1068 = vmatmul.mubr.bf16.vlgmr.msra.gmra.mrb[8].mxu0 %v375_v12  ;;  %1072 = vmatpush3.bf16.msra.mxu1 %v1158_v9 }
 0x1e6   :  { %1092 = vmatpush3.bf16.msra.mxu0 %v1159_v11  ;;  %1073 = vmatprep.subr.bf16.mxu1 %v1229_v1 }
 0x1e7   :  { %1093 = vmatprep.subr.bf16.mxu0 %v1229_v1  ;;  %1087 = vmatprep.mubr.msk.bf16.mxu1 %vm1230_vm2, %v1229_v1 }
 0x1e8   :  { %1107 = vmatprep.mubr.msk.bf16.mxu0 %vm1230_vm2, %v1229_v1 }
 0x1e9   :  { %1074 = vmatpush3.bf16.msra.mxu1 %v1160_v13 }
 0x1ea   :  { %1094 = vmatpush3.bf16.msra.mxu0 %v1161_v14  ;;  %1075 = vmatprep.subr.bf16.mxu1 %v1229_v1 }
 0x1eb   :  { %1095 = vmatprep.subr.bf16.mxu0 %v1229_v1 }
 0x1ed   :  { %1076 = vmatpush3.bf16.msra.mxu1 %v1162_v15 }
 0x1ee   :  { %1096 = vmatpush3.bf16.msra.mxu0 %v1163_v16  ;;  %1077 = vmatprep.subr.bf16.mxu1 %v1229_v1 }
 0x1ef   :  { %1097 = vmatprep.subr.bf16.mxu0 %v1229_v1 }
 0x1f1   :  { %1078 = vmatpush3.bf16.msra.mxu1 %v1164_v17 }
 0x1f2   :  { %1098 = vmatpush3.bf16.msra.mxu0 %v1165_v18  ;;  %1079 = vmatprep.subr.bf16.mxu1 %v1229_v1 }
 0x1f3   :  { %1099 = vmatprep.subr.bf16.mxu0 %v1229_v1 }
 0x1f5   :  { %1080 = vmatpush3.bf16.msra.mxu1 %v1166_v19 }
 0x1f6   :  { %1100 = vmatpush3.bf16.msra.mxu0 %v1167_v20  ;;  %1081 = vmatprep.subr.bf16.mxu1 %v1229_v1 }
 0x1f7   :  { %1101 = vmatprep.subr.bf16.mxu0 %v1229_v1 }
 0x1f9   :  { %1082 = vmatpush3.bf16.msra.mxu1 %v1168_v21 }
 0x1fa   :  { %1102 = vmatpush3.bf16.msra.mxu0 %v1169_v22  ;;  %1083 = vmatprep.subr.bf16.mxu1 %v1229_v1 }
 0x1fb   :  { %1103 = vmatprep.subr.bf16.mxu0 %v1229_v1 }
 0x1fd   :  { %1084 = vmatpush3.bf16.msra.mxu1 %v1170_v23 }
 0x1fe   :  { %1104 = vmatpush3.bf16.msra.mxu0 %v1171_v24  ;;  %1085 = vmatprep.subr.bf16.mxu1 %v1229_v1 }
 0x1ff   :  { %1105 = vmatprep.subr.bf16.mxu0 %v1229_v1 }
 0x201   :  { %1086 = vmatpush3.bf16.msra.mxu1 %v1172_v25 }
 0x202   :  { %1106 = vmatpush3.bf16.msra.mxu0 %v1173_v26 }
 0x2b7   :  { %v481_v29 = vpop.f32.mrb[4].mxu1 }
 0x2b8   :  { %v482_v30 = vadd.f32 %v883_v27, %v481_v29  ;;  %v1049_v31 = vpop.f32.mrb[5].mxu1  ;;  %v594_v32 = vpop.f32.mrb[8].mxu0 }
 0x2b9   :  { %v595_v33 = vadd.f32 %v893_v28, %v594_v32  ;;  %v484_v1 = vpop.f32.mrb[6].mxu1  ;;  %v1069_v34 = vpop.f32.mrb[9].mxu0 }
 0x2ba   :  { %v600_v35 = vmax.f32 %v482_v30, 0.0  ;;  %v1050_v36 = vpop.f32.mrb[7].mxu1  ;;  %v597_v37 = vpop.f32.mrb[10].mxu0 }
 0x2bb   :  { %v602_v38 = vmax.f32 %v595_v33, 0.0  ;;  %v1070_v39 = vpop.f32.mrb[11].mxu0 }
 0x2bc   :  { %v601_v40 = vpack.c.bf16 %v600_v35, %v600_v35 }
 0x2bd   :  { %v603_v41 = vpack.c.bf16 %v602_v38, %v602_v38 }
 0x2be   :  { %1088 = vmatmul.mubr.bf16.vlgmr.msra.gmra.mrb[8].mxu1 %v601_v40 }
 0x2bf   :  { %1108 = vmatmul.mubr.bf16.vlgmr.msra.gmra.mrb[12].mxu0 %v603_v41 }
 0x391   :  { %v709_v44 = vpop.f32.mrb[8].mxu1 }
 0x392   :  { %v710_v45 = vadd.f32 %v902_v42, %v709_v44  ;;  %v1089_v46 = vpop.f32.mrb[9].mxu1  ;;  %v822_v47 = vpop.f32.mrb[12].mxu0 }
 0x393   :  { %v823_v48 = vadd.f32 %v928_v43, %v822_v47  ;;  %v712_v49 = vpop.f32.mrb[10].mxu1  ;;  %v1109_v50 = vpop.f32.mrb[13].mxu0 }
 0x394   :  { %829 = vst.msk [vmem:[%s1501_s9] sm:$0xff] %vm828_vm3, %v710_v45  ;;  %v1090_v51 = vpop.f32.mrb[11].mxu1  ;;  %v825_v52 = vpop.f32.mrb[14].mxu0 }
 0x395   :  { %v1110_v53 = vpop.f32.mrb[15].mxu0  ;;  %831 = vrot.lane.b32.xlu0 %v823_v48, %s1231_s5 }
 0x407   :  { %v832_v54 = vpop.permute.xlu0 %831 }
 0x408   :  { %835 = vst.msk [vmem:[%s1501_s9] sm:$0xff] %vm834_vm4, %v832_v54 }
 0x409   :  { %840 = vsyncpa [#allocation3], 1 }
 0x40a   :  { %841 = vsyncpa [#allocation5], 1 }

</bundles_post_ra>
